<compile_context>
chip_gen: v5e
topology: v5e:2x2
jax: 0.10.0
libtpu: 0.0.40
codegen_flags: <defaults>
</compile_context>

<pallas_src>
import jax
import jax.numpy as jnp
from jax import lax
from jax.experimental import pallas as pl
from jax.experimental.pallas import tpu as pltpu


def _convup_kernel(t_ref, w_ref, b_ref, o_ref):
    """One fused MXU matmul per pixel tile (all 4 sub-pixel phases at once).

    t_ref : (tm, 9*C_in)       bf16  tap-major input rows
    w_ref : (9*C_in, 4*C_out)  bf16  phase-blocked weights, lanes = (dh, dw, co)
    b_ref : (1, 4*C_out)       f32   bias tiled over the 4 phases
    o_ref : (tm, 4*C_out)            output rows, lanes = (dh, dw, co)
    """
    acc = jnp.dot(t_ref[...], w_ref[...], preferred_element_type=jnp.float32)
    o_ref[...] = (acc + b_ref[...]).astype(o_ref.dtype)


def _vmem_capacity_bytes():
    try:
        return int(pltpu.get_tpu_info().vmem_capacity_bytes)
    except Exception:
        return 64 * 1024 * 1024   # conservative (v7x-sized) fallback


def _pick_tile_rows(m_tot, c_in, c_out, vmem_bytes):
    """Pixel-rows per grid step, sized from the part's VMEM capacity."""
    # Double-buffered streaming tiles: bf16 LHS rows + f32 output rows.
    per_row = 2 * (9 * c_in * 2) + 2 * (4 * c_out * 4)
    invariant = 9 * c_in * 4 * c_out * 2 + 4 * c_out * 4   # weights + bias
    budget = int(vmem_bytes * 0.4) - invariant              # headroom for scratch
    tm = max(256, budget // max(per_row, 1))
    tm = min(tm, 4096)                      # per-step overhead already amortized
    tm = min(tm, max(16, m_tot // 2))       # keep >= 2 grid steps (v7x megacore)
    return max(16, (tm // 16) * 16)         # bf16 sublane-tile multiple


def conv_up(x, w, b, *, tm=None, out_dtype=None):
    """ConvTranspose2d(c_in, c_out, kernel=(4,4), stride=(2,2), padding=(1,1)).

    x: (N, C_in, H, W)   w: (C_in, C_out, 4, 4)   b: (C_out,)
    returns: (N, C_out, 2H, 2W)
    """
    N, C_in, H, W = x.shape
    C_out = w.shape[1]
    OH, OW = 2 * H, 2 * W
    K = 9 * C_in          # fused contraction dim (tap-major)
    Nc = 4 * C_out        # fused output lanes (dh, dw, co)
    out_dtype = x.dtype if out_dtype is None else out_dtype

    # ---- input-side glue (all input-sized, cheap): NHWC, bf16, zero-pad by 1.
    x_nhwc = jnp.transpose(x, (0, 2, 3, 1)).astype(jnp.bfloat16)
    x_pad = jnp.pad(x_nhwc, ((0, 0), (1, 1), (1, 1), (0, 0)))   # (N, H+2, W+2, C_in)

    # Tap-major rows: T[n*H*W + p*W + q, (3r+s)*C_in + ci] = x_pad[n, p+r, q+s, ci]
    taps = jnp.stack([x_pad[:, r:r + H, s:s + W, :]
                      for r in range(3) for s in range(3)], axis=3)
    T = taps.reshape(N * H * W, K)

    # Phase-blocked fused weights.  ConvTranspose2d algebra:
    #   out[n, co, 2p+dh, 2q+dw] = bias[co]
    #     + sum_{r,s,ci} x_pad[n, p+r, q+s, ci] * w[ci, co, 3+dh-2r, 3+dw-2s]
    # with the (r,s) term present only when (r-dh) in {0,1} and (s-dw) in {0,1}.
    Wf = jnp.zeros((K, Nc), dtype=w.dtype)
    for r in range(3):
        for s in range(3):
            for dh in range(2):
                for dw in range(2):
                    if (r - dh) in (0, 1) and (s - dw) in (0, 1):
                        Wf = Wf.at[
                            (3 * r + s) * C_in:(3 * r + s + 1) * C_in,
                            (2 * dh + dw) * C_out:(2 * dh + dw + 1) * C_out,
                        ].set(w[:, :, 3 + dh - 2 * r, 3 + dw - 2 * s])
    Wf = Wf.astype(jnp.bfloat16)
    bias_f = jnp.tile(b.astype(jnp.float32), (4,)).reshape(1, Nc)

    # ---- generation-aware tiling (v7x: 64 MiB VMEM, v5e/v6e: 128 MiB).
    Mtot = N * H * W
    vmem_bytes = _vmem_capacity_bytes()
    if tm is None:
        tm = _pick_tile_rows(Mtot, C_in, C_out, vmem_bytes)
    tm = max(16, min(tm, max(16, Mtot)))
    tm = (tm // 16) * 16
    Mp = pl.cdiv(Mtot, tm) * tm
    if Mp != Mtot:
        T = jnp.pad(T, ((0, Mp - Mtot), (0, 0)))

    out_itemsize = jnp.dtype(out_dtype).itemsize
    need = 2 * tm * K * 2 + 2 * tm * Nc * out_itemsize + K * Nc * 2 + Nc * 4
    vmem_limit = int(min(vmem_bytes * 0.9, max(need + (8 << 20), 32 << 20)))

    out = pl.pallas_call(
        _convup_kernel,
        out_shape=jax.ShapeDtypeStruct((Mp, Nc), out_dtype),
        grid_spec=pltpu.PrefetchScalarGridSpec(
            num_scalar_prefetch=0,
            grid=(Mp // tm,),
            in_specs=[
                # streaming pixel tile (double-buffered by default)
                pl.BlockSpec((tm, K), lambda i: (i, 0)),
                # grid-invariant weights / bias: single-buffered
                pl.BlockSpec((K, Nc), lambda i: (0, 0),
                             pipeline_mode=pl.Buffered(1)),
                pl.BlockSpec((1, Nc), lambda i: (0, 0),
                             pipeline_mode=pl.Buffered(1)),
            ],
            out_specs=pl.BlockSpec((tm, Nc), lambda i: (i, 0)),
        ),
        compiler_params=pltpu.CompilerParams(
            dimension_semantics=("parallel",),
            vmem_limit_bytes=vmem_limit,
        ),
        cost_estimate=pl.CostEstimate(
            flops=2 * Mp * K * Nc,
            transcendentals=0,
            bytes_accessed=Mp * K * 2 + K * Nc * 2 + Nc * 4 + Mp * Nc * out_itemsize,
        ),
    )(T, Wf, bias_f)

    # ---- single output-sized rearrangement back to NCHW.
    if Mp != Mtot:
        out = out[:Mtot]
    out = out.reshape(N, H, W, 2, 2, C_out)            # (N, H, W, dh, dw, co)
    out = jnp.transpose(out, (0, 5, 1, 3, 2, 4))       # (N, co, H, dh, W, dw)
    return out.reshape(N, C_out, OH, OW)


def _ref_conv_transpose(x, w, b):
    # pure-JAX f32 reference for the same ConvTranspose2d semantics
    w_conv = jnp.transpose(w[:, :, ::-1, ::-1], (1, 0, 2, 3))   # (C_out, C_in, 4, 4)
    y = lax.conv_general_dilated(
        x, w_conv,
        window_strides=(1, 1),
        padding=((2, 2), (2, 2)),
        lhs_dilation=(2, 2),
        dimension_numbers=("NCHW", "OIHW", "NCHW"),
    )
    return y + b.reshape(1, -1, 1, 1)


if __name__ == "__main__":
    key = jax.random.PRNGKey(0)
    k_x, k_w, k_b = jax.random.split(key, 3)

    N, C_in, C_out, H, W = 2, 4, 8, 16, 16

    x = jax.random.normal(k_x, (N, C_in, H, W), dtype=jnp.float32)
    fan = C_in * 4 * 4
    bound = 1.0 / (fan ** 0.5)
    w = jax.random.uniform(k_w, (C_in, C_out, 4, 4), jnp.float32, -bound, bound)
    b = jax.random.uniform(k_b, (C_out,), jnp.float32, -bound, bound)

    y = jax.block_until_ready(conv_up(x, w, b))
    y_ref = jax.block_until_ready(_ref_conv_transpose(x, w, b))

    assert y.shape == (N, C_out, 2 * H, 2 * W), y.shape
    max_err = float(jnp.max(jnp.abs(y - y_ref)))
    # bf16 MXU operands with f32 accumulation -> loosened tolerance vs f32 ref.
    assert jnp.allclose(y, y_ref, rtol=5e-2, atol=5e-2), max_err

    print("KERNEL_OK")
</pallas_src>

<mosaic_0001>
module attributes {stable_mosaic.version = 11 : i64} {
  func.func @_convup_kernel(%arg0: i32, %arg1: memref<256x36xbf16, #tpu.memory_space<vmem>>, %arg2: memref<36x32xbf16, #tpu.memory_space<vmem>>, %arg3: memref<1x32xf32, #tpu.memory_space<vmem>>, %arg4: memref<256x32xf32, #tpu.memory_space<vmem>>) attributes {dimension_semantics = [#tpu.dimension_semantics<parallel>], iteration_bounds = array<i64: 2>, scalar_prefetch = 0 : i64, scratch_operands = 0 : i64, tpu.core_type = #tpu.core_type<tc>, window_params = [{transform_indices = @transform_0, window_bounds = array<i64: 256, 36>}, {pipeline_mode = #tpu.pipeline_mode<synchronous>, transform_indices = @transform_1, window_bounds = array<i64: 36, 32>}, {pipeline_mode = #tpu.pipeline_mode<synchronous>, transform_indices = @transform_2, window_bounds = array<i64: 1, 32>}, {transform_indices = @transform_3, window_bounds = array<i64: 256, 32>}]} {
    %c0 = arith.constant 0 : index
    %c0_0 = arith.constant 0 : index
    %0 = vector.load %arg1[%c0, %c0_0] : memref<256x36xbf16, #tpu.memory_space<vmem>>, vector<256x36xbf16>
    %c0_1 = arith.constant 0 : index
    %c0_2 = arith.constant 0 : index
    %1 = vector.load %arg2[%c0_1, %c0_2] : memref<36x32xbf16, #tpu.memory_space<vmem>>, vector<36x32xbf16>
    %cst = arith.constant dense<0.000000e+00> : vector<256x32xf32>
    %2 = tpu.matmul %0, %1, %cst {dimension_numbers = #tpu.dot_dimension_numbers<[1], [0], [0], [1], [0, 0, 1, 1], [], []>} : vector<256x36xbf16>, vector<36x32xbf16>, vector<256x32xf32> -> vector<256x32xf32>
    %c0_3 = arith.constant 0 : index
    %c0_4 = arith.constant 0 : index
    %3 = vector.load %arg3[%c0_3, %c0_4] : memref<1x32xf32, #tpu.memory_space<vmem>>, vector<1x32xf32>
    %4 = vector.broadcast %3 : vector<1x32xf32> to vector<256x32xf32>
    %5 = arith.addf %2, %4 : vector<256x32xf32>
    %c0_5 = arith.constant 0 : index
    %c0_6 = arith.constant 0 : index
    %6 = vector.load %arg4[%c0_5, %c0_6] : memref<256x32xf32, #tpu.memory_space<vmem>>, vector<256x32xf32>
    tpu.vector_store %arg4[%c0_5, %c0_6], %5 {strides = array<i32>} : memref<256x32xf32, #tpu.memory_space<vmem>>, vector<256x32xf32>,
    return
  }
  func.func @transform_0(%arg0: i32) -> (i32, i32) {
    %c0_i32 = arith.constant 0 : i32
    %c0_i32_0 = arith.constant 0 : i32
    return %arg0, %c0_i32 : i32, i32
  }
  func.func @transform_1(%arg0: i32) -> (i32, i32) {
    %c0_i32 = arith.constant 0 : i32
    %c0_i32_0 = arith.constant 0 : i32
    %c0_i32_1 = arith.constant 0 : i32
    return %c0_i32, %c0_i32_0 : i32, i32
  }
  func.func @transform_2(%arg0: i32) -> (i32, i32) {
    %c0_i32 = arith.constant 0 : i32
    %c0_i32_0 = arith.constant 0 : i32
    %c0_i32_1 = arith.constant 0 : i32
    return %c0_i32, %c0_i32_0 : i32, i32
  }
  func.func @transform_3(%arg0: i32) -> (i32, i32) {
    %c0_i32 = arith.constant 0 : i32
    %c0_i32_0 = arith.constant 0 : i32
    return %arg0, %c0_i32 : i32, i32
  }
}

</mosaic_0001>

<bundles_post_ra>
// kernel: tpu_custom_call.1
= control target key start
LH: loop header
LB: loop body
LE: loop exit
PB: predicated region body
PF: predicated region fallthrough
CT: control target
= control target key end

     0   :  { %s705_s12 = smov 0   ;;  %s872_s0 = inlined_call_operand.vmem [shape: bf16[512,36], index: 0, kind: input, shape index: {}]   ;;  %s873_s1 = inlined_call_operand.vmem [shape: bf16[36,32], index: 1, kind: input, shape index: {}]   ;;  %s874_s2 = inlined_call_operand.vmem [shape: f32[1,32], index: 2, kind: input, shape index: {}]   ;;  %s875_s3 = inlined_call_operand.vmem [shape: f32[512,32], index: 3, kind: output, shape index: {}]  }
   0x1 LB: > { %s542_s13 = sadd.s32 4294967295, %s683_s12   ;;  %p546_p0 = scmp.ge.s32.totalorder %s683_s12, 1  ;;  %s683_s12 = sphi %s705_s12, %s13_s12  }
   0x2   : > { %p138_p1 = scmp.lt.s32.totalorder %s683_s12, 3 }
   0x4   : > { %p139_p2 = pnand %p546_p0, %p138_p1 }
   0x5   : > { %s547_s16 = sshll.u32 (!%p139_p2), %s542_s13, 5 }
   0x6   : > { %142 = sbr.rel (%p139_p2) target bundleno = 221 (0xdd), region = 32  ;;  %p163_p3 = scmp.lt.s32.totalorder (!%p139_p2), %s547_s16, 63 }
   0xb   : > { %v211_v0 = vld [vmem:[%s873_s1 + $0x10] sm:$0x3]  ;;  %vm360_vm0 = vcmask 1041408   ;;  %s877_s16 = smov (!%p163_p3, %s547_s16), 63  ;;  %v658_v4 = vld [vmem:[%s873_s1 + $0x8] sm:$0xff]  ;;  %v657_v5 = vld [vmem:[%s873_s1] sm:$0xff] }
   0xc   : > { %v305_v1 = vunpack.c.l.b16 %v211_v0  ;;  %s548_s19 = sshll.u32 %s877_s16, 2  ;;  %vm311_vm1 = vcmask 293888   ;;  %s550_s25 = sshll.u32 %s877_s16, 3  ;;  %v766_v22 = vld [vmem:[%s874_s2] ss:$0 sm:$0xff]  ;;  %vm453_vm2 = vcmask 261120  }
   0xd   : > { %s728_s24 = scalar_lea.vmem %s872_s0, %s548_s19  ;;  %s771_s30 = scalar_lea.vmem %s875_s3, %s550_s25 }
   0xe   : > { %v308_v2 = vpack.c.b16 %v305_v1, %v305_v1  ;;  %v641_v6 = vld [vmem:[%s728_s24] sm:$0xff]  ;;  %v642_v10 = vld [vmem:[%s728_s24 + $0x8] sm:$0xff]  ;;  %v643_v14 = vld [vmem:[%s728_s24 + $0x10] sm:$0xff] }
   0xf   : > { %v645_v7 = vld [vmem:[%s728_s24 + $0x20] sm:$0xff]  ;;  %v646_v11 = vld [vmem:[%s728_s24 + $0x28] sm:$0xff]  ;;  %v647_v15 = vld [vmem:[%s728_s24 + $0x30] sm:$0xff] }
  0x10   : > { %v362_v3 = vsel %vm360_vm0, %v308_v2, 0  ;;  %v649_v8 = vld [vmem:[%s728_s24 + $0x40] sm:$0xff]  ;;  %v650_v12 = vld [vmem:[%s728_s24 + $0x48] sm:$0xff]  ;;  %v651_v16 = vld [vmem:[%s728_s24 + $0x50] sm:$0xff] }
  0x11   : > { %369 = vmatpush.bf16.msra.mxu0 %v362_v3  ;;  %659 = vmatpush.bf16.msra.mxu1 %v362_v3  ;;  %v653_v9 = vld [vmem:[%s728_s24 + $0x60] sm:$0xff]  ;;  %v654_v13 = vld [vmem:[%s728_s24 + $0x68] sm:$0xff]  ;;  %v655_v17 = vld [vmem:[%s728_s24 + $0x70] sm:$0xff] }
  0x12   : > { %660 = vmatpush.bf16.msra.mxu2 %v362_v3  ;;  %661 = vmatpush.bf16.msra.mxu3 %v362_v3  ;;  %v644_v18 = vld [vmem:[%s728_s24 + $0x18] sm:$0xff] }
  0x13   : > { %v648_v19 = vld [vmem:[%s728_s24 + $0x38] sm:$0xff] }
  0x14   : > { %v652_v20 = vld [vmem:[%s728_s24 + $0x58] sm:$0xff] }
  0x15   : > { %370 = vmatpush.bf16.msra.mxu0 %v658_v4  ;;  %662 = vmatpush.bf16.msra.mxu1 %v658_v4  ;;  %v656_v21 = vld [vmem:[%s728_s24 + $0x78] sm:$0xff] }
  0x16   : > { %663 = vmatpush.bf16.msra.mxu2 %v658_v4  ;;  %664 = vmatpush.bf16.msra.mxu3 %v658_v4 }
  0x19   : > { %371 = vmatpush.bf16.msra.mxu0 %v657_v5  ;;  %665 = vmatpush.bf16.msra.mxu1 %v657_v5 }
  0x1a   : > { %666 = vmatpush.bf16.msra.mxu2 %v657_v5  ;;  %667 = vmatpush.bf16.msra.mxu3 %v657_v5 }
  0x1c   : > { %623 = vmatmul.msk.bf16.vlgmr.msra.gmra.mxu0 %vm311_vm1, %v641_v6  ;;  %627 = vmatmul.msk.bf16.vlgmr.msra.gmra.mxu1 %vm311_vm1, %v645_v7 }
  0x1d   : > { %631 = vmatmul.msk.bf16.vlgmr.msra.gmra.mxu2 %vm311_vm1, %v649_v8  ;;  %635 = vmatmul.msk.bf16.vlgmr.msra.gmra.mxu3 %vm311_vm1, %v653_v9 }
  0x2c   : > { %624 = vmatmul.msk.bf16.gmra.mxu0 %vm311_vm1, %v642_v10  ;;  %628 = vmatmul.msk.bf16.gmra.mxu1 %vm311_vm1, %v646_v11 }
  0x2d   : > { %632 = vmatmul.msk.bf16.gmra.mxu2 %vm311_vm1, %v650_v12  ;;  %636 = vmatmul.msk.bf16.gmra.mxu3 %vm311_vm1, %v654_v13 }
  0x3c   : > { %625 = vmatmul.msk.bf16.gmra.mxu0 %vm311_vm1, %v643_v14  ;;  %629 = vmatmul.msk.bf16.gmra.mxu1 %vm311_vm1, %v647_v15 }
  0x3d   : > { %633 = vmatmul.msk.bf16.gmra.mxu2 %vm311_vm1, %v651_v16  ;;  %637 = vmatmul.msk.bf16.gmra.mxu3 %vm311_vm1, %v655_v17 }
  0x4c   : > { %626 = vmatmul.msk.bf16.gmra.mxu0 %vm311_vm1, %v644_v18  ;;  %630 = vmatmul.msk.bf16.gmra.mxu1 %vm311_vm1, %v648_v19 }
  0x4d   : > { %634 = vmatmul.msk.bf16.gmra.mxu2 %vm311_vm1, %v652_v20  ;;  %638 = vmatmul.msk.bf16.gmra.mxu3 %vm311_vm1, %v656_v21 }
  0x99   : > { %v373_v23 = vpop.f32.mrf.mxu0  ;;  %v393_v24 = vpop.f32.mrf.mxu1 }
  0x9a   : > { %v374_v25 = vadd.f32 %v766_v22, %v373_v23  ;;  %v394_v26 = vadd.f32 %v766_v22, %v393_v24 }
  0x9c   : > { %454 = vst.msk [vmem:[%s771_s30] sm:$0xff] %vm453_vm2, %v374_v25 }
  0x9d   : > { %462 = vst.msk [vmem:[%s771_s30 + $0x40] sm:$0xff] %vm453_vm2, %v394_v26 }
  0xa0   : > { %v413_v27 = vpop.f32.mrf.mxu2  ;;  %v433_v28 = vpop.f32.mrf.mxu3 }
  0xa1   : > { %v414_v29 = vadd.f32 %v766_v22, %v413_v27  ;;  %v434_v30 = vadd.f32 %v766_v22, %v433_v28  ;;  %v375_v31 = vpop.f32.mrf.mxu0  ;;  %v395_v32 = vpop.f32.mrf.mxu1 }
  0xa2   : > { %v376_v33 = vadd.f32 %v766_v22, %v375_v31  ;;  %v396_v34 = vadd.f32 %v766_v22, %v395_v32 }
  0xa3   : > { %470 = vst.msk [vmem:[%s771_s30 + $0x80] sm:$0xff] %vm453_vm2, %v414_v29 }
  0xa4   : > { %478 = vst.msk [vmem:[%s771_s30 + $0xc0] sm:$0xff] %vm453_vm2, %v434_v30 }
  0xa5   : > { %455 = vst.msk [vmem:[%s771_s30 + $0x8] sm:$0xff] %vm453_vm2, %v376_v33 }
  0xa6   : > { %463 = vst.msk [vmem:[%s771_s30 + $0x48] sm:$0xff] %vm453_vm2, %v396_v34 }
  0xa8   : > { %v415_v35 = vpop.f32.mrf.mxu2  ;;  %v435_v36 = vpop.f32.mrf.mxu3 }
  0xa9   : > { %v416_v37 = vadd.f32 %v766_v22, %v415_v35  ;;  %v436_v38 = vadd.f32 %v766_v22, %v435_v36  ;;  %v378_v39 = vpop.f32.mrf.mxu0  ;;  %v398_v40 = vpop.f32.mrf.mxu1 }
  0xaa   : > { %v379_v41 = vadd.f32 %v766_v22, %v378_v39  ;;  %v399_v42 = vadd.f32 %v766_v22, %v398_v40 }
  0xab   : > { %471 = vst.msk [vmem:[%s771_s30 + $0x88] sm:$0xff] %vm453_vm2, %v416_v37 }
  0xac   : > { %479 = vst.msk [vmem:[%s771_s30 + $0xc8] sm:$0xff] %vm453_vm2, %v436_v38 }
  0xad   : > { %456 = vst.msk [vmem:[%s771_s30 + $0x10] sm:$0xff] %vm453_vm2, %v379_v41 }
  0xae   : > { %464 = vst.msk [vmem:[%s771_s30 + $0x50] sm:$0xff] %vm453_vm2, %v399_v42 }
  0xb0   : > { %v418_v43 = vpop.f32.mrf.mxu2  ;;  %v438_v44 = vpop.f32.mrf.mxu3 }
  0xb1   : > { %v419_v45 = vadd.f32 %v766_v22, %v418_v43  ;;  %v439_v46 = vadd.f32 %v766_v22, %v438_v44  ;;  %v380_v47 = vpop.f32.mrf.mxu0  ;;  %v400_v48 = vpop.f32.mrf.mxu1 }
  0xb2   : > { %v381_v49 = vadd.f32 %v766_v22, %v380_v47  ;;  %v401_v50 = vadd.f32 %v766_v22, %v400_v48 }
  0xb3   : > { %472 = vst.msk [vmem:[%s771_s30 + $0x90] sm:$0xff] %vm453_vm2, %v419_v45 }
  0xb4   : > { %480 = vst.msk [vmem:[%s771_s30 + $0xd0] sm:$0xff] %vm453_vm2, %v439_v46 }
  0xb5   : > { %457 = vst.msk [vmem:[%s771_s30 + $0x18] sm:$0xff] %vm453_vm2, %v381_v49 }
  0xb6   : > { %465 = vst.msk [vmem:[%s771_s30 + $0x58] sm:$0xff] %vm453_vm2, %v401_v50 }
  0xb8   : > { %v420_v51 = vpop.f32.mrf.mxu2  ;;  %v440_v52 = vpop.f32.mrf.mxu3 }
  0xb9   : > { %v421_v53 = vadd.f32 %v766_v22, %v420_v51  ;;  %v441_v54 = vadd.f32 %v766_v22, %v440_v52  ;;  %v383_v55 = vpop.f32.mrf.mxu0  ;;  %v403_v56 = vpop.f32.mrf.mxu1 }
  0xba   : > { %v384_v57 = vadd.f32 %v766_v22, %v383_v55  ;;  %v404_v58 = vadd.f32 %v766_v22, %v403_v56 }
  0xbb   : > { %473 = vst.msk [vmem:[%s771_s30 + $0x98] sm:$0xff] %vm453_vm2, %v421_v53 }
  0xbc   : > { %481 = vst.msk [vmem:[%s771_s30 + $0xd8] sm:$0xff] %vm453_vm2, %v441_v54 }
  0xbd   : > { %458 = vst.msk [vmem:[%s771_s30 + $0x20] sm:$0xff] %vm453_vm2, %v384_v57 }
  0xbe   : > { %466 = vst.msk [vmem:[%s771_s30 + $0x60] sm:$0xff] %vm453_vm2, %v404_v58 }
  0xc0   : > { %v423_v59 = vpop.f32.mrf.mxu2  ;;  %v443_v60 = vpop.f32.mrf.mxu3 }
  0xc1   : > { %v424_v61 = vadd.f32 %v766_v22, %v423_v59  ;;  %v444_v62 = vadd.f32 %v766_v22, %v443_v60  ;;  %v385_v63 = vpop.f32.mrf.mxu0  ;;  %v405_v0 = vpop.f32.mrf.mxu1 }
  0xc2   : > { %v386_v1 = vadd.f32 %v766_v22, %v385_v63  ;;  %v406_v2 = vadd.f32 %v766_v22, %v405_v0 }
  0xc3   : > { %474 = vst.msk [vmem:[%s771_s30 + $0xa0] sm:$0xff] %vm453_vm2, %v424_v61 }
  0xc4   : > { %482 = vst.msk [vmem:[%s771_s30 + $0xe0] sm:$0xff] %vm453_vm2, %v444_v62 }
  0xc5   : > { %459 = vst.msk [vmem:[%s771_s30 + $0x28] sm:$0xff] %vm453_vm2, %v386_v1 }
  0xc6   : > { %467 = vst.msk [vmem:[%s771_s30 + $0x68] sm:$0xff] %vm453_vm2, %v406_v2 }
  0xc8   : > { %v425_v3 = vpop.f32.mrf.mxu2  ;;  %v445_v4 = vpop.f32.mrf.mxu3 }
  0xc9   : > { %v426_v5 = vadd.f32 %v766_v22, %v425_v3  ;;  %v446_v6 = vadd.f32 %v766_v22, %v445_v4  ;;  %v388_v7 = vpop.f32.mrf.mxu0  ;;  %v408_v8 = vpop.f32.mrf.mxu1 }
  0xca   : > { %v389_v9 = vadd.f32 %v766_v22, %v388_v7  ;;  %v409_v10 = vadd.f32 %v766_v22, %v408_v8 }
  0xcb   : > { %475 = vst.msk [vmem:[%s771_s30 + $0xa8] sm:$0xff] %vm453_vm2, %v426_v5 }
  0xcc   : > { %483 = vst.msk [vmem:[%s771_s30 + $0xe8] sm:$0xff] %vm453_vm2, %v446_v6 }
  0xcd   : > { %460 = vst.msk [vmem:[%s771_s30 + $0x30] sm:$0xff] %vm453_vm2, %v389_v9 }
  0xce   : > { %468 = vst.msk [vmem:[%s771_s30 + $0x70] sm:$0xff] %vm453_vm2, %v409_v10 }
  0xd0   : > { %v428_v11 = vpop.f32.mrf.mxu2  ;;  %v448_v12 = vpop.f32.mrf.mxu3 }
  0xd1   : > { %v429_v13 = vadd.f32 %v766_v22, %v428_v11  ;;  %v449_v14 = vadd.f32 %v766_v22, %v448_v12  ;;  %v390_v15 = vpop.f32.mrf.mxu0  ;;  %v410_v16 = vpop.f32.mrf.mxu1 }
  0xd2   : > { %v391_v17 = vadd.f32 %v766_v22, %v390_v15  ;;  %v411_v18 = vadd.f32 %v766_v22, %v410_v16 }
  0xd3   : > { %476 = vst.msk [vmem:[%s771_s30 + $0xb0] sm:$0xff] %vm453_vm2, %v429_v13 }
  0xd4   : > { %484 = vst.msk [vmem:[%s771_s30 + $0xf0] sm:$0xff] %vm453_vm2, %v449_v14 }
  0xd5   : > { %461 = vst.msk [vmem:[%s771_s30 + $0x38] sm:$0xff] %vm453_vm2, %v391_v17 }
  0xd6   : > { %469 = vst.msk [vmem:[%s771_s30 + $0x78] sm:$0xff] %vm453_vm2, %v411_v18 }
  0xd8   : > { %v430_v19 = vpop.f32.mrf.mxu2  ;;  %v450_v20 = vpop.f32.mrf.mxu3 }
  0xd9   : > { %v431_v21 = vadd.f32 %v766_v22, %v430_v19  ;;  %v451_v23 = vadd.f32 %v766_v22, %v450_v20 }
  0xdb   : > { %477 = vst.msk [vmem:[%s771_s30 + $0xb8] sm:$0xff] %vm453_vm2, %v431_v21 }
  0xdc   : > { %485 = vst.msk [vmem:[%s771_s30 + $0xf8] sm:$0xff] %vm453_vm2, %v451_v23 }
  0xdd PF: > { %s13_s12 = sadd.s32 1, %s683_s12  }
  0xde   : > { %p10_p4 = scmp.ge.s32.totalorder %s13_s12, 4  }
  0xe0   :  { %12 = sbr.rel (!%p10_p4) target bundleno = 1 (0x1), region = 62 }

</bundles_post_ra>
